<compile_context>
chip_gen: v7x
topology: tpu7x:2x2x1
jax: 0.10.0
libtpu: 0.0.40
codegen_flags: <defaults>
</compile_context>

<pallas_src>
import functools

import jax
import jax.numpy as jnp
from jax import lax
from jax.experimental import pallas as pl
from jax.experimental.pallas import tpu as pltpu


def _round_up(x, m):
    return ((x + m - 1) // m) * m


def _vmem_limit_bytes():
    """Generation-aware VMEM limit: ~75% of physical, capped at 96 MiB."""
    cap = 64 * 1024 * 1024
    try:
        info = pltpu.get_tpu_info()
        cap = int(getattr(info, "vmem_capacity_bytes", cap))
    except Exception:
        pass
    return max(32 * 1024 * 1024, min(int(cap * 0.75), 96 * 1024 * 1024))


def _fit_rows(tn, row_bytes, budget):
    """Shrink the row tile (multiples of 8) until double-buffering fits."""
    while tn > 8 and 2 * tn * row_bytes > budget:
        tn = max(8, _round_up(tn // 2, 8))
    return tn


# ---------------------------------------------------------------------------
# nn_embed kernels
# ---------------------------------------------------------------------------

def _embed_small_kernel(idx_ref, table_ref, out_ref):
    """VMEM-resident table: gather one tile via one-hot x table on the MXU.

    idx_ref  : VMEM (TN, 1) int32
    table_ref: VMEM (C, D)    (same block every grid step -> resident)
    out_ref  : VMEM (TN, D)
    """
    tn = out_ref.shape[0]
    c = table_ref.shape[0]
    col = lax.broadcasted_iota(jnp.int32, (tn, c), 1)          # (TN, C)
    onehot = (idx_ref[...] == col).astype(table_ref.dtype)     # exact select
    out_ref[...] = jnp.dot(
        onehot, table_ref[...], preferred_element_type=jnp.float32
    ).astype(out_ref.dtype)


def _embed_gather_kernel(idx_ref, table_hbm, out_ref, sem):
    """DMA row-gather for one tile of TN indices, straight into out_ref.

    idx_ref  : SMEM (n_pad,) int32   -- scalar-prefetched indices
    table_hbm: HBM  (C, D)           -- untiled embedding table (pl.ANY)
    out_ref  : VMEM (TN, D)          -- output tile (DMA destination)
    sem      : DMA semaphore (1,)    -- shared by all TN row copies
    """
    tn, _ = out_ref.shape
    base = pl.program_id(0) * tn

    def _issue(r, carry):
        row = idx_ref[base + r]
        pltpu.make_async_copy(
            table_hbm.at[pl.ds(row, 1), :],
            out_ref.at[pl.ds(r, 1), :],
            sem.at[0],
        ).start()
        return carry

    lax.fori_loop(0, tn, _issue, 0)

    def _drain(r, carry):
        # All copies are identically shaped (1, D); waiting TN times on the
        # shared semaphore guarantees every issued copy has landed.
        pltpu.make_async_copy(
            table_hbm.at[pl.ds(0, 1), :],
            out_ref.at[pl.ds(r, 1), :],
            sem.at[0],
        ).wait()
        return carry

    lax.fori_loop(0, tn, _drain, 0)


# ---------------------------------------------------------------------------
# one-hot kernel (k logical rows packed per physical output row)
# ---------------------------------------------------------------------------

def _onehot_kernel(idx_ref, out_ref, *, c, k):
    """idx_ref: (TN, k) int32; out_ref: (TN, k*C) int32.

    Packed-row r, slot j gets its hot bit at lane j*C + idx[r, j], which makes
    the output tile lane-dense (k*C == 128 when C divides 128).
    """
    tn = out_ref.shape[0]
    idx = idx_ref[...]                                          # (TN, k)
    col = lax.broadcasted_iota(jnp.int32, (tn, k * c), 1)       # (TN, k*C)
    hot = col == idx[:, 0:1]
    for j in range(1, k):
        hot = hot | (col == (idx[:, j:j + 1] + j * c))
    out_ref[...] = hot.astype(out_ref.dtype)


# ---------------------------------------------------------------------------
# wrapper
# ---------------------------------------------------------------------------

def category_embedding(category, table, to="nn_embed", block_rows=128,
                       use_dma_gather=None):
    """Forward pass of CategoryEmbedding.

    category:       integer array of arbitrary shape.
    table:          (num_categories, embedding_dim) embedding weights.
    to:             'nn_embed' (row gather) or 'onehot'.
    block_rows:     flattened indices processed per grid step (rounded to a
                    multiple of 8, clamped to the VMEM budget).
    use_dma_gather: None = auto (VMEM-resident table when it is small),
                    True/False forces the HBM DMA-gather / resident path.
    """
    orig_shape = category.shape
    c, d = table.shape
    itemsize = jnp.dtype(table.dtype).itemsize
    table_bytes = c * d * itemsize
    vmem_limit = _vmem_limit_bytes()
    budget = vmem_limit // 4   # leave headroom for double buffers + pipeline

    idx = category.reshape(-1).astype(jnp.int32)
    # Clamp instead of crashing on out-of-range indices (PyTorch would raise);
    # avoids unchecked OOB DMA reads on TPU.
    idx = jnp.clip(idx, 0, c - 1)
    n = idx.shape[0]

    if to == "nn_embed":
        tn = min(_round_up(max(block_rows, 8), 8), _round_up(n, 8))
        tn = _fit_rows(tn, d * itemsize, budget)
        n_pad = _round_up(n, tn)
        grid = (n_pad // tn,)

        small_ok = table_bytes <= 4 * 1024 * 1024 and c <= 4096
        use_small = small_ok if use_dma_gather is None else (not use_dma_gather)

        if use_small:
            idx2d = idx.reshape(-1, 1)
            if n_pad != n:
                idx2d = jnp.pad(idx2d, ((0, n_pad - n), (0, 0)))
            cost = pl.CostEstimate(
                flops=2 * n_pad * c * d,
                transcendentals=0,
                bytes_accessed=n_pad * 4 + table_bytes + n_pad * d * itemsize,
            )
            out = pl.pallas_call(
                _embed_small_kernel,
                out_shape=jax.ShapeDtypeStruct((n_pad, d), table.dtype),
                grid=grid,
                in_specs=[
                    pl.BlockSpec((tn, 1), lambda i: (i, 0)),
                    pl.BlockSpec((c, d), lambda i: (0, 0)),   # resident table
                ],
                out_specs=pl.BlockSpec((tn, d), lambda i: (i, 0)),
                compiler_params=pltpu.CompilerParams(
                    dimension_semantics=("parallel",),
                    vmem_limit_bytes=vmem_limit,
                ),
                cost_estimate=cost,
            )(idx2d, table)
        else:
            idx_pad = idx if n_pad == n else jnp.pad(idx, (0, n_pad - n))
            cost = pl.CostEstimate(
                flops=0,
                transcendentals=0,
                bytes_accessed=n_pad * 4 + 2 * n_pad * d * itemsize,
            )
            out = pl.pallas_call(
                _embed_gather_kernel,
                out_shape=jax.ShapeDtypeStruct((n_pad, d), table.dtype),
                grid_spec=pltpu.PrefetchScalarGridSpec(
                    num_scalar_prefetch=1,
                    grid=grid,
                    in_specs=[pl.BlockSpec(memory_space=pl.ANY)],  # table, HBM
                    out_specs=pl.BlockSpec((tn, d), lambda i, idx_ref: (i, 0)),
                    scratch_shapes=[pltpu.SemaphoreType.DMA((1,))],
                ),
                compiler_params=pltpu.CompilerParams(
                    dimension_semantics=("parallel",),
                    vmem_limit_bytes=vmem_limit,
                ),
                cost_estimate=cost,
            )(idx_pad, table)

        if n_pad != n:
            out = out[:n]
        return out.reshape(*orig_shape, d)

    elif to == "onehot":
        # PyTorch one_hot returns int64; TPU kernel emits int32 (same values).
        out_dtype = jnp.int32
        if c < 128 and 128 % c == 0:
            k = min(128 // c, 32)          # pack k rows -> lane-dense output
        else:
            k = 1
        rows = -(-n // k)
        tn = min(_round_up(max(block_rows // k, 8), 8), _round_up(rows, 8))
        tn = _fit_rows(tn, k * c * 4, budget)
        rows_pad = _round_up(rows, tn)
        n_pad = rows_pad * k

        idx_pk = idx if n_pad == n else jnp.pad(idx, (0, n_pad - n))
        idx_pk = idx_pk.reshape(rows_pad, k)

        cost = pl.CostEstimate(
            flops=0,
            transcendentals=0,
            bytes_accessed=n_pad * 4 + n_pad * c * 4,
        )
        out = pl.pallas_call(
            functools.partial(_onehot_kernel, c=c, k=k),
            out_shape=jax.ShapeDtypeStruct((rows_pad, k * c), out_dtype),
            grid=(rows_pad // tn,),
            in_specs=[pl.BlockSpec((tn, k), lambda i: (i, 0))],
            out_specs=pl.BlockSpec((tn, k * c), lambda i: (i, 0)),
            compiler_params=pltpu.CompilerParams(
                dimension_semantics=("parallel",),
                vmem_limit_bytes=vmem_limit,
            ),
            cost_estimate=cost,
        )(idx_pk)

        out = out.reshape(n_pad, c)        # contiguous reshape: no extra copy
        if n_pad != n:
            out = out[:n]
        return out.reshape(*orig_shape, c)

    else:
        # TODO(synk): PyTorch branch only emits a DeprecationWarning and then
        # returns an undefined variable; no sensible kernel equivalent.
        raise ValueError("err, please check the embedding or onehot")


if __name__ == "__main__":
    num_categories = 16
    embedding_dim = 32

    key = jax.random.PRNGKey(0)
    k_tab, k_idx = jax.random.split(key)

    # nn.Embedding default init: weights ~ N(0, 1)
    table = jax.random.normal(
        k_tab, (num_categories, embedding_dim), dtype=jnp.float32
    )
    category = jax.random.randint(k_idx, (2, 8), 0, num_categories, dtype=jnp.int32)

    # Auto path (small table -> VMEM-resident MXU gather).
    embedded = category_embedding(category, table, to="nn_embed")
    # Force the HBM DMA-gather path too, so both code paths are exercised.
    embedded_dma = category_embedding(
        category, table, to="nn_embed", use_dma_gather=True
    )
    onehot = category_embedding(category, table, to="onehot")
    jax.block_until_ready((embedded, embedded_dma, onehot))

    # sanity check against plain-JAX reference
    ref_embed = table[category]
    ref_onehot = jax.nn.one_hot(category, num_categories, dtype=jnp.int32)
    assert embedded.shape == (2, 8, embedding_dim)
    assert onehot.shape == (2, 8, num_categories)
    assert jnp.allclose(embedded, ref_embed, atol=1e-6)
    assert jnp.allclose(embedded_dma, ref_embed, atol=1e-6)
    assert jnp.array_equal(onehot, ref_onehot)

    print("KERNEL_OK")
</pallas_src>

<mosaic_0001>
module attributes {stable_mosaic.version = 11 : i64} {
  func.func @_embed_small_kernel(%arg0: i32, %arg1: memref<16x1xi32, #tpu.memory_space<vmem>>, %arg2: memref<16x32xf32, #tpu.memory_space<vmem>>, %arg3: memref<16x32xf32, #tpu.memory_space<vmem>>) attributes {dimension_semantics = [#tpu.dimension_semantics<parallel>], iteration_bounds = array<i64: 1>, scalar_prefetch = 0 : i64, scratch_operands = 0 : i64, tpu.core_type = #tpu.core_type<tc>, window_params = [{transform_indices = @transform_0, window_bounds = array<i64: 16, 1>}, {pipeline_mode = #tpu.pipeline_mode<synchronous>, transform_indices = @transform_1, window_bounds = array<i64: 16, 32>}, {transform_indices = @transform_2, window_bounds = array<i64: 16, 32>}]} {
    %0 = tpu.iota {dimensions = array<i32: 1>} : vector<16x16xi32>
    %c0 = arith.constant 0 : index
    %c0_0 = arith.constant 0 : index
    %1 = vector.load %arg1[%c0, %c0_0] : memref<16x1xi32, #tpu.memory_space<vmem>>, vector<16x1xi32>
    %2 = vector.broadcast %1 : vector<16x1xi32> to vector<16x16xi32>
    %3 = arith.cmpi eq, %2, %0 : vector<16x16xi32>
    %4 = arith.extui %3 : vector<16x16xi1> to vector<16x16xi32>
    %5 = arith.sitofp %4 : vector<16x16xi32> to vector<16x16xf32>
    %c0_1 = arith.constant 0 : index
    %c0_2 = arith.constant 0 : index
    %6 = vector.load %arg2[%c0_1, %c0_2] : memref<16x32xf32, #tpu.memory_space<vmem>>, vector<16x32xf32>
    %cst = arith.constant dense<0.000000e+00> : vector<16x32xf32>
    %7 = tpu.matmul %5, %6, %cst {dimension_numbers = #tpu.dot_dimension_numbers<[1], [0], [0], [1], [0, 0, 1, 1], [], []>} : vector<16x16xf32>, vector<16x32xf32>, vector<16x32xf32> -> vector<16x32xf32>
    %c0_3 = arith.constant 0 : index
    %c0_4 = arith.constant 0 : index
    %8 = vector.load %arg3[%c0_3, %c0_4] : memref<16x32xf32, #tpu.memory_space<vmem>>, vector<16x32xf32>
    tpu.vector_store %arg3[%c0_3, %c0_4], %7 {strides = array<i32>} : memref<16x32xf32, #tpu.memory_space<vmem>>, vector<16x32xf32>,
    return
  }
  func.func @transform_0(%arg0: i32) -> (i32, i32) {
    %c0_i32 = arith.constant 0 : i32
    %c0_i32_0 = arith.constant 0 : i32
    return %arg0, %c0_i32 : i32, i32
  }
  func.func @transform_1(%arg0: i32) -> (i32, i32) {
    %c0_i32 = arith.constant 0 : i32
    %c0_i32_0 = arith.constant 0 : i32
    %c0_i32_1 = arith.constant 0 : i32
    return %c0_i32, %c0_i32_0 : i32, i32
  }
  func.func @transform_2(%arg0: i32) -> (i32, i32) {
    %c0_i32 = arith.constant 0 : i32
    %c0_i32_0 = arith.constant 0 : i32
    return %arg0, %c0_i32 : i32, i32
  }
}

</mosaic_0001>

<bundles_post_ra>
// kernel: tpu_custom_call.1
= control target key start
LH: loop header
LB: loop body
LE: loop exit
PB: predicated region body
PF: predicated region fallthrough
CT: control target
= control target key end

     0   :  { %s224_s0 = inlined_call_operand.vmem [shape: s32[16,1], index: 0, kind: input, shape index: {}]   ;;  %s225_s1 = inlined_call_operand.vmem [shape: f32[16,32], index: 1, kind: input, shape index: {}]   ;;  %s226_s2 = inlined_call_operand.hbm [shape: f32[16,32], index: 2, kind: output, shape index: {}]  }
   0x1   :  { %v14_v0 = vld [vmem:[%s224_s0] sm:$0xff] }
   0x2   :  { %7 = vsyncpa [#allocation3], 0  ;;  %v180_v1 = vmov 0   ;;  %v28_v2 = vld [vmem:[%s225_s1] sm:$0xff]  ;;  %v29_v3 = vld [vmem:[%s225_s1 + $0x8] sm:$0xff]  ;;  %v12_v6 = vlaneseq  ;;  %vm30_vm0 = vcmask 130048  }
   0x3   :  { %155 = vset.pattern.permute.xlu0 %v180_v1  ;;  %v146_v4 = vpack.c.bf16 %v29_v3, %v28_v2  ;;  %v15_v5 = vld [vmem:[%s224_s0 + $0x8] sm:$0xff]  ;;  %v181_v9 = vmov 0.0   ;;  %s182_s1 = smov [#allocation2]   ;;  %vm112_vm3 = vcmask 261120  }
   0x4   :  { %17 = vperm.xlu0 %155, %v14_v0   ;;  %v13_v7 = vand.u32 127, %v12_v6  ;;  %s120_s17 = sshll.u32 %s182_s1, 4  ;;  %s121_s17 = int_to_ptr.vmem [resolvable:$true] %s120_s17 }
   0x5   :  { %147 = vmatprep.subr.bf16.mxu0 %v146_v4  ;;  %s156_s0 = scalar_lea.vmem %s121_s17, 256  ;;  %p161_p1 = scmp.lt.s32.totalorder %s121_s17, %s121_s17 }
   0x6   :  { %149 = vmatpush3.bf16.msra.mxu0 %v146_v4  ;;  %p157_p0 = scmp.ne.s32.totalorder %s121_s17, %s156_s0  ;;  %p162_p2 = scmp.lt.s32.totalorder %s156_s0, %s156_s0 }
   0x8   :  { %20 = vperm.xlu0 %155, %v15_v5   ;;  %p163_p3 = por %p162_p2, %p161_p1 }
   0xa   :  { %p164_p4 = pnand %p163_p3, %p157_p0 }
  0x83   :  { %v18_v8 = vpop.permute.xlu0 %17 }
  0x84   :  { %vm22_vm1 = vcmp.eq.s32.totalorder %v18_v8, %v13_v7 }
  0x85   :  { %v131_v10 = vsel %vm22_vm1, 1.0, %v181_v9 }
  0x86   :  { %143 = vmatprep.mubr.msk.f32.mxu0 %vm30_vm0, %v131_v10 }
  0x87   :  { %v21_v11 = vpop.permute.xlu0 %20 }
  0x88   :  { %vm23_vm2 = vcmp.eq.s32.totalorder %v21_v11, %v13_v7 }
  0x89   :  { %v132_v12 = vsel %vm23_vm2, 1.0, %v181_v9 }
  0x8a   :  { %144 = vmatmul.mubr.msk.f32.vlgmr.msra.gmra.mrb[0].mxu0 %vm30_vm0, %v132_v12 }
 0x15d   :  { %v145_v13 = vpop.f32.mrb[0].mxu0 }
 0x15e   :  { %114 = vst.msk [vmem:[#allocation2 + $0x8] sm:$0xff] %vm112_vm3, %v145_v13  ;;  %v103_v14 = vpop.f32.mrb[1].mxu0 }
 0x15f   :  { %113 = vst.msk [vmem:[#allocation2] sm:$0xff] %vm112_vm3, %v103_v14 }
 0x160   :  { %167 = shalt.err (!%p164_p4)
}
 0x161   :  { %s168_s20 = scalar_lea.hbm %s226_s2, 256 }
 0x162   :  { %p169_p5 = scmp.ne.s32.totalorder %s226_s2, %s168_s20  ;;  %p172_p6 = scmp.lt.u32.totalorder %s168_s20, %s226_s2 }
 0x164   :  { %p174_p7 = pnand %p172_p6, %p169_p5 }
 0x166   :  { %177 = shalt.err (!%p174_p7)
}
 0x167   :  { %s183_s25 = smov 128   ;;  %s184_s26 = smov 8  }
 0x168   :  { %126 = dma.vmem_to_hbm [thread:$0]  %s121_s17, 256, %s226_s2, [#allocation3], %s183_s25, %s183_s25, %s184_s26  }
 0x169   :  { %178 = dma.done.wait [#allocation3], 256  }
 0x16a   :  { %179 = vsyncadd [#allocation3], 4294967040 }
 0x16b   :  { %130 = vsyncpa [#allocation3], 1 }

</bundles_post_ra>
